<compile_context>
chip_gen: v6e
topology: v6e:2x2x1
jax: 0.10.0
libtpu: 0.0.40
codegen_flags: <defaults>
</compile_context>

<pallas_src>
import jax
import jax.numpy as jnp
from jax.experimental import pallas as pl
from jax.experimental.pallas import tpu as pltpu


def _mf_kernel(u_ref, f_ref, bias_ref, o_ref):
    # u_ref, f_ref : (TB, H)  gathered embedding slabs (batch on sublanes)
    # bias_ref     : (1, TB)  user_bias + food_bias + global_mean (lane-dense)
    # o_ref        : (1, TB)  output slab (lane-dense)
    u = u_ref[...].astype(jnp.float32)          # f32 accumulate (v5e: no bf16 VPU)
    f = f_ref[...].astype(jnp.float32)
    dot = jnp.sum(u * f, axis=1)                # (TB,)  lane (XLU) reduce
    o_ref[...] = dot[None, :] + bias_ref[...]


def _round_up(x, m):
    return (x + m - 1) // m * m


def mf_forward(user, food, user_embed, food_embed, user_bias, food_bias,
               global_mean=1.0, block_b=2048, slab_dtype=jnp.float32):
    """Pallas equivalent of MF.forward(user, food)."""
    user = user.astype(jnp.int32)
    food = food.astype(jnp.int32)
    B = user.shape[0]
    H = user_embed.shape[1]

    # Batch tile: multiple of 128, no bigger than the (padded) batch itself.
    block_b = max(128, min(block_b, _round_up(B, 128)))
    n_blocks = pl.cdiv(B, block_b)
    b_pad = n_blocks * block_b
    pad = b_pad - B

    # Pad the cheap int32 index vectors, not the large slabs.
    if pad:
        user_p = jnp.pad(user, (0, pad))
        food_p = jnp.pad(food, (0, pad))
    else:
        user_p, food_p = user, food

    # Row gather in its natural (B_pad, H) layout: no transpose, no slab pad.
    u_g = jnp.take(user_embed, user_p, axis=0).astype(slab_dtype)
    f_g = jnp.take(food_embed, food_p, axis=0).astype(slab_dtype)

    # Single combined bias stream: user_bias + food_bias + global_mean.
    bias = (jnp.take(user_bias[:, 0], user_p, axis=0)
            + jnp.take(food_bias[:, 0], food_p, axis=0)
            + jnp.float32(global_mean)).astype(jnp.float32)[None, :]

    # Double-buffered working set -> scoped-VMEM limit with headroom, capped
    # so it is also safe on v7x (64 MiB physical VMEM per TensorCore).
    slab_bytes = block_b * H * jnp.dtype(slab_dtype).itemsize
    working = 2 * (2 * slab_bytes + 2 * block_b * 4)
    vmem_limit = int(min(max(working * 2, 32 * 1024 * 1024), 48 * 1024 * 1024))

    out = pl.pallas_call(
        _mf_kernel,
        out_shape=jax.ShapeDtypeStruct((1, b_pad), jnp.float32),
        grid=(n_blocks,),
        in_specs=[
            pl.BlockSpec((block_b, H), lambda i: (i, 0)),
            pl.BlockSpec((block_b, H), lambda i: (i, 0)),
            pl.BlockSpec((1, block_b), lambda i: (0, i)),
        ],
        out_specs=pl.BlockSpec((1, block_b), lambda i: (0, i)),
        compiler_params=pltpu.CompilerParams(
            dimension_semantics=("parallel",),
            vmem_limit_bytes=vmem_limit),
    )(u_g, f_g, bias)

    # PyTorch: (u * b).sum(1) + u_b.squeeze() + b_b.squeeze() + mean -> (B,)
    return out[0, :B]


def _xavier_uniform(key, shape):
    fan_in, fan_out = shape[0], shape[1]
    bound = (6.0 / (fan_in + fan_out)) ** 0.5
    return jax.random.uniform(key, shape, jnp.float32, -bound, bound)


def _reference(user, food, user_embed, food_embed, user_bias, food_bias,
               global_mean):
    u = user_embed[user]                      # (B, H)
    b = food_embed[food]                      # (B, H)
    u_b = user_bias[user][:, 0]               # (B,)
    b_b = food_bias[food][:, 0]               # (B,)
    return (u * b).sum(axis=1) + u_b + b_b + global_mean


if __name__ == "__main__":
    # Small, forward-consistent shapes.
    USER_SIZE = 16
    FOOD_SIZE = 24
    HIDDEN = 32
    BATCH = 8
    GLOBAL_MEAN = 1.0

    key = jax.random.PRNGKey(0)
    k_ue, k_fe, k_u, k_f = jax.random.split(key, 4)

    # Deterministic parameter init mirroring the PyTorch __init__:
    #   xavier_uniform_ on both embedding tables, biases filled with 0.
    # (padding_idx only affects gradients / initial fill, not forward math.)
    user_embed = _xavier_uniform(k_ue, (USER_SIZE, HIDDEN))
    food_embed = _xavier_uniform(k_fe, (FOOD_SIZE, HIDDEN))
    user_bias = jnp.zeros((USER_SIZE, 1), jnp.float32)
    food_bias = jnp.zeros((FOOD_SIZE, 1), jnp.float32)

    user = jax.random.randint(k_u, (BATCH,), 0, USER_SIZE, dtype=jnp.int32)
    food = jax.random.randint(k_f, (BATCH,), 0, FOOD_SIZE, dtype=jnp.int32)

    ref = _reference(user, food, user_embed, food_embed, user_bias, food_bias,
                     GLOBAL_MEAN)

    # f32 path (exact PyTorch semantics).
    out = mf_forward(user, food, user_embed, food_embed, user_bias, food_bias,
                     GLOBAL_MEAN)
    out = jax.block_until_ready(out)
    assert out.shape == (BATCH,)
    assert jnp.allclose(out, ref, atol=1e-5, rtol=1e-5), (out, ref)

    # bf16 slab-feed path (half HBM traffic on the dominant tensors).
    out_bf16 = mf_forward(user, food, user_embed, food_embed, user_bias,
                          food_bias, GLOBAL_MEAN, slab_dtype=jnp.bfloat16)
    out_bf16 = jax.block_until_ready(out_bf16)
    assert out_bf16.shape == (BATCH,)
    assert jnp.allclose(out_bf16, ref, atol=3e-2, rtol=3e-2), (out_bf16, ref)

    print("KERNEL_OK")
</pallas_src>

<mosaic_0001>
module attributes {stable_mosaic.version = 11 : i64} {
  func.func @_mf_kernel(%arg0: i32, %arg1: memref<128x32xf32, #tpu.memory_space<vmem>>, %arg2: memref<128x32xf32, #tpu.memory_space<vmem>>, %arg3: memref<1x128xf32, #tpu.memory_space<vmem>>, %arg4: memref<1x128xf32, #tpu.memory_space<vmem>>) attributes {dimension_semantics = [#tpu.dimension_semantics<parallel>], iteration_bounds = array<i64: 1>, scalar_prefetch = 0 : i64, scratch_operands = 0 : i64, tpu.core_type = #tpu.core_type<tc>, window_params = [{transform_indices = @transform_0, window_bounds = array<i64: 128, 32>}, {transform_indices = @transform_1, window_bounds = array<i64: 128, 32>}, {transform_indices = @transform_2, window_bounds = array<i64: 1, 128>}, {transform_indices = @transform_3, window_bounds = array<i64: 1, 128>}]} {
    %c0 = arith.constant 0 : index
    %c0_0 = arith.constant 0 : index
    %0 = vector.load %arg1[%c0, %c0_0] : memref<128x32xf32, #tpu.memory_space<vmem>>, vector<128x32xf32>
    %c0_1 = arith.constant 0 : index
    %c0_2 = arith.constant 0 : index
    %1 = vector.load %arg2[%c0_1, %c0_2] : memref<128x32xf32, #tpu.memory_space<vmem>>, vector<128x32xf32>
    %2 = arith.mulf %0, %1 : vector<128x32xf32>
    %cst = arith.constant dense<0.000000e+00> : vector<128xf32>
    %3 = vector.multi_reduction <add>, %2, %cst [1] : vector<128x32xf32> to vector<128xf32>
    %4 = vector.shape_cast %3 : vector<128xf32> to vector<1x128xf32>
    %c0_3 = arith.constant 0 : index
    %c0_4 = arith.constant 0 : index
    %5 = vector.load %arg3[%c0_3, %c0_4] : memref<1x128xf32, #tpu.memory_space<vmem>>, vector<1x128xf32>
    %6 = arith.addf %4, %5 : vector<1x128xf32>
    %c0_5 = arith.constant 0 : index
    %c0_6 = arith.constant 0 : index
    %7 = vector.load %arg4[%c0_5, %c0_6] : memref<1x128xf32, #tpu.memory_space<vmem>>, vector<1x128xf32>
    tpu.vector_store %arg4[%c0_5, %c0_6], %6 {strides = array<i32>} : memref<1x128xf32, #tpu.memory_space<vmem>>, vector<1x128xf32>,
    return
  }
  func.func @transform_0(%arg0: i32) -> (i32, i32) {
    %c0_i32 = arith.constant 0 : i32
    %c0_i32_0 = arith.constant 0 : i32
    return %arg0, %c0_i32 : i32, i32
  }
  func.func @transform_1(%arg0: i32) -> (i32, i32) {
    %c0_i32 = arith.constant 0 : i32
    %c0_i32_0 = arith.constant 0 : i32
    return %arg0, %c0_i32 : i32, i32
  }
  func.func @transform_2(%arg0: i32) -> (i32, i32) {
    %c0_i32 = arith.constant 0 : i32
    %c0_i32_0 = arith.constant 0 : i32
    return %c0_i32, %arg0 : i32, i32
  }
  func.func @transform_3(%arg0: i32) -> (i32, i32) {
    %c0_i32 = arith.constant 0 : i32
    %c0_i32_0 = arith.constant 0 : i32
    return %c0_i32, %arg0 : i32, i32
  }
}

</mosaic_0001>

<bundles_post_ra>
// kernel: tpu_custom_call.1
= control target key start
LH: loop header
LB: loop body
LE: loop exit
PB: predicated region body
PF: predicated region fallthrough
CT: control target
= control target key end

     0   :  { %vm63_vm0 = vcmask 261120   ;;  %s607_s0 = inlined_call_operand.vmem [shape: f32[128,32], index: 0, kind: input, shape index: {}]   ;;  %s608_s1 = inlined_call_operand.vmem [shape: f32[128,32], index: 1, kind: input, shape index: {}]   ;;  %s609_s2 = inlined_call_operand.vmem [shape: f32[1,128], index: 2, kind: input, shape index: {}]   ;;  %s610_s3 = inlined_call_operand.hbm [shape: f32[1,128], index: 3, kind: output, shape index: {}]  }
   0x1   :  { %v17_v0 = vld [vmem:[%s607_s0 + $0x10] sm:$0xff]  ;;  %v15_v2 = vld [vmem:[%s607_s0] sm:$0xff]  ;;  %v18_v5 = vld [vmem:[%s607_s0 + $0x18] sm:$0xff] }
   0x2   :  { %v33_v1 = vld [vmem:[%s608_s1 + $0x10] sm:$0xff]  ;;  %v31_v4 = vld [vmem:[%s608_s1] sm:$0xff]  ;;  %v34_v6 = vld [vmem:[%s608_s1 + $0x18] sm:$0xff] }
   0x3   :  { %v49_v3 = vmul.f32 %v33_v1, %v17_v0  ;;  %v47_v7 = vmul.f32 %v31_v4, %v15_v2  ;;  %v50_v8 = vmul.f32 %v34_v6, %v18_v5  ;;  %v16_v9 = vld [vmem:[%s607_s0 + $0x8] sm:$0xff]  ;;  %v19_v15 = vld [vmem:[%s607_s0 + $0x20] sm:$0xff]  ;;  %v22_v22 = vld [vmem:[%s607_s0 + $0x38] sm:$0xff] }
   0x4   :  { %v32_v10 = vld [vmem:[%s608_s1 + $0x8] sm:$0xff]  ;;  %v35_v16 = vld [vmem:[%s608_s1 + $0x20] sm:$0xff]  ;;  %v38_v23 = vld [vmem:[%s608_s1 + $0x38] sm:$0xff] }
   0x5   :  { %v20_v11 = vld [vmem:[%s607_s0 + $0x28] sm:$0xff]  ;;  %v70_v12 = vsel %vm63_vm0, %v49_v3, 0.0  ;;  %v48_v13 = vmul.f32 %v32_v10, %v16_v9  ;;  %v64_v17 = vsel %vm63_vm0, %v47_v7, 0.0  ;;  %v73_v18 = vsel %vm63_vm0, %v50_v8, 0.0  ;;  %v21_v24 = vld [vmem:[%s607_s0 + $0x30] sm:$0xff]  ;;  %v23_v32 = vld [vmem:[%s607_s0 + $0x40] sm:$0xff] }
   0x6   :  { %v36_v14 = vld [vmem:[%s608_s1 + $0x28] sm:$0xff]  ;;  %71 = vadd.xlane.f32.xlu1 %v70_v12  ;;  %65 = vadd.xlane.f32.xlu0 %v64_v17  ;;  %v51_v21 = vmul.f32 %v35_v16, %v19_v15  ;;  %v37_v25 = vld [vmem:[%s608_s1 + $0x30] sm:$0xff]  ;;  %v54_v27 = vmul.f32 %v38_v23, %v22_v22  ;;  %v39_v33 = vld [vmem:[%s608_s1 + $0x40] sm:$0xff] }
   0x7   :  { %v52_v19 = vmul.f32 %v36_v14, %v20_v11  ;;  %v67_v20 = vsel %vm63_vm0, %v48_v13, 0.0  ;;  %v53_v29 = vmul.f32 %v37_v25, %v21_v24  ;;  %v24_v30 = vld [vmem:[%s607_s0 + $0x48] sm:$0xff] }
   0x8   :  { %v76_v28 = vsel %vm63_vm0, %v51_v21, 0.0  ;;  %v40_v31 = vld [vmem:[%s608_s1 + $0x48] sm:$0xff] }
   0x9   :  { %v79_v26 = vsel %vm63_vm0, %v52_v19, 0.0 }
   0xa   :  { %74 = vadd.xlane.f32.xlu1 %v73_v18  ;;  %68 = vadd.xlane.f32.xlu0 %v67_v20 }
   0xb   :  { %8 = vsyncpa [#allocation3], 0  ;;  %v85_v34 = vsel %vm63_vm0, %v54_v27, 0.0  ;;  %v56_v35 = vmul.f32 %v40_v31, %v24_v30  ;;  %v82_v36 = vsel %vm63_vm0, %v53_v29, 0.0  ;;  %v55_v37 = vmul.f32 %v39_v33, %v23_v32  ;;  %v26_v38 = vld [vmem:[%s607_s0 + $0x58] sm:$0xff]  ;;  %v25_v40 = vld [vmem:[%s607_s0 + $0x50] sm:$0xff] }
   0xc   :  { %v42_v39 = vld [vmem:[%s608_s1 + $0x58] sm:$0xff]  ;;  %v41_v41 = vld [vmem:[%s608_s1 + $0x50] sm:$0xff]  ;;  %v28_v46 = vld [vmem:[%s607_s0 + $0x68] sm:$0xff]  ;;  %v431_v57 = vmov 0   ;;  %vm288_vm1 = vcmask 130112   ;;  %vm295_vm2 = vcmask 195712  }
   0xd   :  { %v91_v42 = vsel %vm63_vm0, %v56_v35, 0.0  ;;  %v58_v43 = vmul.f32 %v42_v39, %v26_v38  ;;  %v88_v44 = vsel %vm63_vm0, %v55_v37, 0.0  ;;  %v57_v45 = vmul.f32 %v41_v41, %v25_v40  ;;  %v44_v47 = vld [vmem:[%s608_s1 + $0x68] sm:$0xff]  ;;  %v27_v48 = vld [vmem:[%s607_s0 + $0x60] sm:$0xff]  ;;  %408 = vset.pattern.permute.xlu1 %v431_v57  ;;  %407 = vset.pattern.permute.xlu0 %v431_v57  ;;  %v29_v58 = vld [vmem:[%s607_s0 + $0x70] sm:$0xff] }
   0xe   :  { %80 = vadd.xlane.f32.xlu1 %v79_v26  ;;  %77 = vadd.xlane.f32.xlu0 %v76_v28  ;;  %v43_v49 = vld [vmem:[%s608_s1 + $0x60] sm:$0xff]  ;;  %v60_v51 = vmul.f32 %v44_v47, %v28_v46  ;;  %v45_v59 = vld [vmem:[%s608_s1 + $0x70] sm:$0xff]  ;;  %v30_v61 = vld [vmem:[%s607_s0 + $0x78] sm:$0xff]  ;;  %vm302_vm3 = vcmask 261312   ;;  %vm309_vm4 = vcmask 326912   ;;  %vm316_vm5 = vcmask 392512  }
   0xf   :  { %v97_v50 = vsel %vm63_vm0, %v58_v43, 0.0  ;;  %v94_v52 = vsel %vm63_vm0, %v57_v45, 0.0  ;;  %v59_v53 = vmul.f32 %v43_v49, %v27_v48  ;;  %v404_v56 = vld [vmem:[%s609_s2] ss:$0 sm:$0xff]  ;;  %v61_v60 = vmul.f32 %v45_v59, %v29_v58  ;;  %v46_v62 = vld [vmem:[%s608_s1 + $0x78] sm:$0xff]  ;;  %s432_s0 = smov [#allocation2]  }
  0x10   :  { %v103_v54 = vsel %vm63_vm0, %v60_v51, 0.0  ;;  %v62_v0 = vmul.f32 %v46_v62, %v30_v61  ;;  %vm323_vm6 = vcmask 458112   ;;  %vm330_vm7 = vcmask 523712   ;;  %s396_s1 = sshll.u32 %s432_s0, 4  ;;  %s397_s1 = int_to_ptr.vmem [resolvable:$true] %s396_s1 }
  0x11   :  { %v100_v55 = vsel %vm63_vm0, %v59_v53, 0.0  ;;  %v106_v63 = vsel %vm63_vm0, %v61_v60, 0.0  ;;  %vm337_vm8 = vcmask 589312   ;;  %vm344_vm9 = vcmask 654912   ;;  %s409_s23 = scalar_lea.vmem %s397_s1, 16  ;;  %s413_s24 = scalar_lea.vmem %s397_s1, 32 }
  0x12   :  { %86 = vadd.xlane.f32.xlu1 %v85_v34  ;;  %83 = vadd.xlane.f32.xlu0 %v82_v36  ;;  %v109_v1 = vsel %vm63_vm0, %v62_v0, 0.0  ;;  %vm351_vm10 = vcmask 720512   ;;  %vm358_vm11 = vcmask 786112   ;;  %vm365_vm12 = vcmask 851712   ;;  %p410_p0 = scmp.ne.s32.totalorder %s397_s1, %s409_s23  ;;  %p414_p1 = scmp.lt.s32.totalorder %s397_s1, %s397_s1 }
  0x13   :  { %vm372_vm13 = vcmask 917312   ;;  %vm379_vm14 = vcmask 982912   ;;  %vm386_vm15 = vcmask 1048512   ;;  %p415_p2 = scmp.lt.s32.totalorder %s413_s24, %s409_s23 }
  0x15   :  { %p416_p3 = por %p415_p2, %p414_p1 }
  0x16   :  { %92 = vadd.xlane.f32.xlu1 %v91_v42  ;;  %89 = vadd.xlane.f32.xlu0 %v88_v44 }
  0x17   :  { %p417_p4 = pnand %p416_p3, %p410_p0 }
  0x1a   :  { %98 = vadd.xlane.f32.xlu1 %v97_v50  ;;  %95 = vadd.xlane.f32.xlu0 %v94_v52  ;;  %v277_v50 = vlaneseq }
  0x1c   :  { %v568_v51 = vand.u32 127, %v277_v50  ;;  %v570_v52 = vshrl.u32 %v277_v50, 7 }
  0x1e   :  { %104 = vadd.xlane.f32.xlu1 %v103_v54  ;;  %101 = vadd.xlane.f32.xlu0 %v100_v55  ;;  %v283_v53 = vadd.s32 4294967288, %v568_v51  ;;  %v297_v57 = vadd.s32 4294967272, %v568_v51  ;;  %v304_v58 = vadd.s32 4294967264, %v568_v51  ;;  %v281_v60 = vsub.s32 %v568_v51, %v570_v52 }
  0x20   :  { %v286_v59 = vsub.s32 %v283_v53, %v570_v52  ;;  %v300_v0 = vsub.s32 %v297_v57, %v570_v52  ;;  %v381_v53 = vadd.s32 4294967176, %v568_v51 }
  0x2f   :  { %123 = vbcast.lane.b32.xlu1 %v404_v56, 264 }
  0x34   :  { %119 = vbcast.lane.b32.xlu0 %v404_v56, 256 }
  0x38   :  { %127 = vbcast.lane.b32.xlu0 %v404_v56, 272 }
  0x53   :  { %107 = vadd.xlane.f32.xlu1 %v106_v63 }
  0x57   :  { %110 = vadd.xlane.f32.xlu0 %v109_v1  ;;  %v311_v1 = vadd.s32 4294967256, %v568_v51 }
  0x64   :  { %131 = vbcast.lane.b32.xlu1 %v404_v56, 280 }
  0x68   :  { %139 = vbcast.lane.b32.xlu1 %v404_v56, 296 }
  0x6c   :  { %143 = vbcast.lane.b32.xlu1 %v404_v56, 304 }
  0x6d   :  { %135 = vbcast.lane.b32.xlu0 %v404_v56, 288 }
  0x70   :  { %147 = vbcast.lane.b32.xlu1 %v404_v56, 312 }
  0x71   :  { %151 = vbcast.lane.b32.xlu0 %v404_v56, 320 }
  0x74   :  { %155 = vbcast.lane.b32.xlu1 %v404_v56, 328 }
  0x75   :  { %159 = vbcast.lane.b32.xlu0 %v404_v56, 336 }
  0x78   :  { %163 = vbcast.lane.b32.xlu1 %v404_v56, 344 }
  0x79   :  { %167 = vbcast.lane.b32.xlu0 %v404_v56, 352 }
  0x7c   :  { %171 = vbcast.lane.b32.xlu1 %v404_v56, 360 }
  0x7d   :  { %175 = vbcast.lane.b32.xlu0 %v404_v56, 368 }
  0x80   :  { %179 = vbcast.lane.b32.xlu1 %v404_v56, 376  ;;  %v290_v56 = vadd.s32 4294967280, %v568_v51 }
  0x82   :  { %v293_v61 = vsub.s32 %v290_v56, %v570_v52 }
  0x8f   :  { %v72_v2 = vpop.xlane.xlu1 %71  ;;  %v66_v3 = vpop.xlane.xlu0 %65 }
  0x93   :  { %v75_v4 = vpop.xlane.xlu1 %74  ;;  %v69_v5 = vpop.xlane.xlu0 %68 }
  0x97   :  { %v81_v6 = vpop.xlane.xlu1 %80  ;;  %v78_v7 = vpop.xlane.xlu0 %77 }
  0x9b   :  { %v87_v8 = vpop.xlane.xlu1 %86  ;;  %v84_v9 = vpop.xlane.xlu0 %83 }
  0x9f   :  { %v93_v10 = vpop.xlane.xlu1 %92  ;;  %v90_v11 = vpop.xlane.xlu0 %89 }
  0xa3   :  { %v99_v12 = vpop.xlane.xlu1 %98  ;;  %v96_v13 = vpop.xlane.xlu0 %95 }
  0xa7   :  { %v105_v14 = vpop.xlane.xlu1 %104  ;;  %v102_v15 = vpop.xlane.xlu0 %101 }
  0xab   :  { %v124_v16 = vpop.permute.xlu1 %123  ;;  %v120_v18 = vpop.permute.xlu0 %119 }
  0xac   :  { %v198_v17 = vadd.f32 %v124_v16, %v69_v5  ;;  %v197_v19 = vadd.f32 %v120_v18, %v66_v3  ;;  %v318_v3 = vadd.s32 4294967248, %v568_v51 }
  0xae   :  { %233 = vperm.xlu1 %408, %v198_v17   ;;  %230 = vperm.xlu0 %407, %v197_v19  }
  0xaf   :  { %v128_v20 = vpop.permute.xlu0 %127 }
  0xb0   :  { %v199_v21 = vadd.f32 %v128_v20, %v72_v2  ;;  %v307_v2 = vsub.s32 %v304_v58, %v570_v52 }
  0xb2   :  { %236 = vperm.xlu1 %408, %v199_v21   ;;  %v339_v21 = vadd.s32 4294967224, %v568_v51 }
  0xdc   :  { %v108_v22 = vpop.xlane.xlu1 %107 }
  0xe0   :  { %v132_v23 = vpop.permute.xlu1 %131  ;;  %v111_v25 = vpop.xlane.xlu0 %110 }
  0xe1   :  { %v200_v24 = vadd.f32 %v132_v23, %v75_v4 }
  0xe3   :  { %239 = vperm.xlu0 %407, %v200_v24  }
  0xe4   :  { %v140_v26 = vpop.permute.xlu1 %139  ;;  %v136_v28 = vpop.permute.xlu0 %135 }
  0xe5   :  { %v202_v27 = vadd.f32 %v140_v26, %v81_v6  ;;  %v201_v29 = vadd.f32 %v136_v28, %v78_v7 }
  0xe7   :  { %245 = vperm.xlu0 %407, %v202_v27   ;;  %242 = vperm.xlu1 %408, %v201_v29  }
  0xe8   :  { %v144_v30 = vpop.permute.xlu1 %143  ;;  %v152_v32 = vpop.permute.xlu0 %151 }
  0xe9   :  { %v203_v31 = vadd.f32 %v144_v30, %v84_v9  ;;  %v205_v36 = vadd.f32 %v152_v32, %v90_v11  ;;  %v314_v9 = vsub.s32 %v311_v1, %v570_v52  ;;  %v342_v30 = vsub.s32 %v339_v21, %v570_v52 }
  0xeb   :  { %248 = vperm.xlu1 %408, %v203_v31   ;;  %v353_v31 = vadd.s32 4294967208, %v568_v51 }
  0xec   :  { %v148_v33 = vpop.permute.xlu1 %147  ;;  %v160_v35 = vpop.permute.xlu0 %159 }
  0xed   :  { %v204_v34 = vadd.f32 %v148_v33, %v87_v8  ;;  %v207_v40 = vadd.f32 %v160_v35, %v96_v13  ;;  %v321_v13 = vsub.s32 %v318_v3, %v570_v52  ;;  %v360_v35 = vadd.s32 4294967200, %v568_v51 }
  0xef   :  { %251 = vperm.xlu0 %407, %v204_v34   ;;  %254 = vperm.xlu1 %408, %v205_v36  }
  0xf0   :  { %v156_v37 = vpop.permute.xlu1 %155  ;;  %v168_v39 = vpop.permute.xlu0 %167 }
  0xf1   :  { %v206_v38 = vadd.f32 %v156_v37, %v93_v10  ;;  %v209_v43 = vadd.f32 %v168_v39, %v102_v15  ;;  %v325_v10 = vadd.s32 4294967240, %v568_v51 }
  0xf3   :  { %257 = vperm.xlu0 %407, %v206_v38   ;;  %260 = vperm.xlu1 %408, %v207_v40   ;;  %v328_v20 = vsub.s32 %v325_v10, %v570_v52  ;;  %v356_v40 = vsub.s32 %v353_v31, %v570_v52 }
  0xf4   :  { %v164_v41 = vpop.permute.xlu1 %163  ;;  %v176_v44 = vpop.permute.xlu0 %175 }
  0xf5   :  { %v208_v42 = vadd.f32 %v164_v41, %v99_v12  ;;  %v211_v47 = vadd.f32 %v176_v44, %v108_v22  ;;  %v367_v41 = vadd.s32 4294967192, %v568_v51  ;;  %v363_v44 = vsub.s32 %v360_v35, %v570_v52 }
  0xf7   :  { %263 = vperm.xlu0 %407, %v208_v42   ;;  %266 = vperm.xlu1 %408, %v209_v43   ;;  %v370_v50 = vsub.s32 %v367_v41, %v570_v52 }
  0xf8   :  { %v172_v45 = vpop.permute.xlu1 %171 }
  0xf9   :  { %v210_v46 = vadd.f32 %v172_v45, %v105_v14  ;;  %v332_v14 = vadd.s32 4294967232, %v568_v51  ;;  %v374_v45 = vadd.s32 4294967184, %v568_v51 }
  0xfb   :  { %269 = vperm.xlu0 %407, %v210_v46   ;;  %272 = vperm.xlu1 %408, %v211_v47   ;;  %v335_v24 = vsub.s32 %v332_v14, %v570_v52  ;;  %v377_v56 = vsub.s32 %v374_v45, %v570_v52 }
  0xfc   :  { %v180_v48 = vpop.permute.xlu1 %179 }
  0xfd   :  { %v212_v49 = vadd.f32 %v180_v48, %v111_v25  ;;  %v346_v25 = vadd.s32 4294967216, %v568_v51 }
  0xff   :  { %275 = vperm.xlu0 %407, %v212_v49   ;;  %v349_v34 = vsub.s32 %v346_v25, %v570_v52 }
 0x129   :  { %v234_v54 = vpop.permute.xlu1 %233  ;;  %v231_v55 = vpop.permute.xlu0 %230 }
 0x12a   :  { %v287_v4 = vrot.slane %v234_v54, %v286_v59  ;;  %v282_v5 = vrot.slane %v231_v55, %v281_v60 }
 0x12c   :  { %v289_v15 = vsel %vm288_vm1, %v287_v4, %v282_v5 }
 0x12d   :  { %v237_v63 = vpop.permute.xlu1 %236 }
 0x12e   :  { %v294_v6 = vrot.slane %v237_v63, %v293_v61  ;;  %v384_v61 = vsub.s32 %v381_v53, %v570_v52 }
 0x130   :  { %v296_v16 = vsel %vm295_vm2, %v294_v6, %v289_v15 }
 0x15e   :  { %v240_v62 = vpop.permute.xlu0 %239 }
 0x15f   :  { %v301_v7 = vrot.slane %v240_v62, %v300_v0 }
 0x161   :  { %v303_v17 = vsel %vm302_vm3, %v301_v7, %v296_v16 }
 0x162   :  { %v243_v8 = vpop.permute.xlu1 %242  ;;  %v246_v12 = vpop.permute.xlu0 %245 }
 0x163   :  { %v308_v11 = vrot.slane %v243_v8, %v307_v2  ;;  %v315_v18 = vrot.slane %v246_v12, %v314_v9 }
 0x165   :  { %v310_v22 = vsel %vm309_vm4, %v308_v11, %v303_v17 }
 0x166   :  { %v249_v19 = vpop.permute.xlu1 %248  ;;  %v317_v27 = vsel %vm316_vm5, %v315_v18, %v310_v22 }
 0x167   :  { %v322_v23 = vrot.slane %v249_v19, %v321_v13 }
 0x169   :  { %v324_v32 = vsel %vm323_vm6, %v322_v23, %v317_v27 }
 0x16a   :  { %v252_v26 = vpop.permute.xlu0 %251  ;;  %v255_v28 = vpop.permute.xlu1 %254 }
 0x16b   :  { %v329_v29 = vrot.slane %v252_v26, %v328_v20  ;;  %v336_v33 = vrot.slane %v255_v28, %v335_v24 }
 0x16d   :  { %v331_v36 = vsel %vm330_vm7, %v329_v29, %v324_v32 }
 0x16e   :  { %v258_v37 = vpop.permute.xlu0 %257  ;;  %v261_v38 = vpop.permute.xlu1 %260  ;;  %v338_v43 = vsel %vm337_vm8, %v336_v33, %v331_v36 }
 0x16f   :  { %v343_v39 = vrot.slane %v258_v37, %v342_v30  ;;  %v350_v42 = vrot.slane %v261_v38, %v349_v34 }
 0x171   :  { %v345_v46 = vsel %vm344_vm9, %v343_v39, %v338_v43 }
 0x172   :  { %v264_v47 = vpop.permute.xlu0 %263  ;;  %v267_v48 = vpop.permute.xlu1 %266  ;;  %v352_v55 = vsel %vm351_vm10, %v350_v42, %v345_v46 }
 0x173   :  { %v357_v49 = vrot.slane %v264_v47, %v356_v40  ;;  %v364_v54 = vrot.slane %v267_v48, %v363_v44 }
 0x175   :  { %v359_v57 = vsel %vm358_vm11, %v357_v49, %v352_v55 }
 0x176   :  { %v270_v58 = vpop.permute.xlu0 %269  ;;  %v273_v59 = vpop.permute.xlu1 %272  ;;  %v366_v63 = vsel %vm365_vm12, %v364_v54, %v359_v57 }
 0x177   :  { %v371_v60 = vrot.slane %v270_v58, %v370_v50  ;;  %v378_v62 = vrot.slane %v273_v59, %v377_v56 }
 0x179   :  { %v373_v0 = vsel %vm372_vm13, %v371_v60, %v366_v63 }
 0x17a   :  { %v276_v1 = vpop.permute.xlu0 %275  ;;  %v380_v2 = vsel %vm379_vm14, %v378_v62, %v373_v0 }
 0x17b   :  { %v385_v51 = vrot.slane %v276_v1, %v384_v61 }
 0x17d   :  { %v387_v3 = vsel %vm386_vm15, %v385_v51, %v380_v2 }
 0x17e   :  { %389 = vst [vmem:[#allocation2] sm:$0x1] %v387_v3 }
 0x17f   :  { %420 = shalt.err (!%p417_p4)
}
 0x180   :  { %399 = dma.vmem_to_hbm [thread:$0]  %s397_s1, 16, %s610_s3, [#allocation3]  }
 0x181   :  { %429 = dma.done.wait [#allocation3], 16  }
 0x182   :  { %430 = vsyncadd [#allocation3], 4294967280 }
 0x183   :  { %403 = vsyncpa [#allocation3], 1 }

</bundles_post_ra>
